<compile_context>
chip_gen: v5e
topology: v5e:2x2
jax: 0.10.0
libtpu: 0.0.40
codegen_flags: <defaults>
</compile_context>

<pallas_src>
import jax
import jax.numpy as jnp
from jax.experimental import pallas as pl
from jax.experimental.pallas import tpu as pltpu

_LANE = 128


def _scale_kernel(w_ref, x_ref, o_ref):
    # w_ref: (1, ct) [shared], (rt, 1) [column] or (rt, ct) [full];
    # x_ref / o_ref: (rt, ct).  Multiply in the promoted dtype (torch.mul promotion),
    # then cast to the requested output dtype.
    o_ref[...] = (w_ref[...] * x_ref[...]).astype(o_ref.dtype)


def _round_up(a, b):
    return ((a + b - 1) // b) * b


def scale_module_forward(weight, x, *, out_dtype=None,
                         target_block_bytes=3 * 1024 * 1024,
                         max_vmem_budget_bytes=24 * 1024 * 1024):
    """Pallas implementation of _ScaleModule.forward: torch.mul(weight, x) (NCHW x)."""
    if x.ndim != 4:
        raise ValueError(f"expected NCHW activation, got rank {x.ndim}")
    N, C, H, W = x.shape
    hw = H * W

    w = jnp.asarray(weight)
    if w.ndim > 4:
        raise ValueError(f"weight rank {w.ndim} > activation rank 4")
    wshape4 = (1,) * (4 - w.ndim) + tuple(w.shape)
    if jnp.broadcast_shapes(wshape4, tuple(x.shape)) != tuple(x.shape):
        raise ValueError(f"weight shape {w.shape} does not broadcast to {x.shape}")
    w4 = w.reshape(wshape4)

    if out_dtype is None:
        out_dtype = jnp.promote_types(w.dtype, x.dtype)   # torch.mul promotion
    out_dtype = jnp.dtype(out_dtype)

    # ---- layout selection: lane-dense last dim + compact weight -------------------
    spatially_const = (wshape4[2] == 1 and wshape4[3] == 1)
    if spatially_const and hw % _LANE == 0:
        # Per-channel / per-sample scalar scale, lane-dense spatial dim: the weight
        # collapses to a (rows, 1) column (tiny HBM traffic).
        mode = "column"
        rows, cols = N * C, hw
        w2d = jnp.broadcast_to(w4, (N, C, 1, 1)).reshape(rows, 1)
    elif wshape4[0] == 1:
        # Weight is constant over the batch dim: keep ONE compact (1, C*H*W) row,
        # reused across all row blocks (resident in VMEM, read once from HBM).
        # This also makes the last dim wide (C*H*W), so stores are lane-dense even
        # when H*W itself is not a multiple of 128 (7x7, 14x14, ...).
        mode = "shared"
        rows, cols = N, C * hw
        w2d = jnp.broadcast_to(w4, (1, C, H, W)).reshape(1, cols)
    else:
        # Weight varies along the batch dim AND spatially: no compact form exists;
        # stream the full-size weight alongside x (pick the lane-denser flatten).
        mode = "full"
        if hw % _LANE == 0:
            rows, cols = N * C, hw
        else:
            rows, cols = N, C * hw
        w2d = jnp.broadcast_to(w4, tuple(x.shape)).reshape(rows, cols)

    x2d = x.reshape(rows, cols)

    # ---- tile sizing (byte-targeted, VMEM-padding-aware) ---------------------------
    x_b = jnp.dtype(x.dtype).itemsize
    o_b = out_dtype.itemsize
    w_b = jnp.dtype(w2d.dtype).itemsize
    min_item = min(x_b, o_b, w_b)
    row_align = max(8, 32 // min_item)          # f32 -> 8, bf16 -> 16, int8 -> 32
    pcols = _round_up(cols, _LANE)

    def footprint(rt, ct):
        # Double-buffered pipeline footprint including lane/sublane padding.
        prt = _round_up(rt, row_align)
        pct = _round_up(ct, _LANE)
        xf = prt * pct * x_b
        of = prt * pct * o_b
        if mode == "column":
            wf = prt * _LANE * w_b              # (rt, 1) block pads to 128 lanes
        elif mode == "shared":
            wf = row_align * pct * w_b          # (1, ct) block pads sublanes
        else:
            wf = prt * pct * w_b
        return 2 * (xf + of + wf)

    col_tile = cols                             # prefer full-width (contiguous DMA)
    if rows <= row_align:
        row_tile = rows                         # full-dim block: always layout-legal
    else:
        rt = (target_block_bytes // max(1, pcols * x_b)) // row_align * row_align
        row_tile = int(min(rows, max(row_align, rt)))
        while row_tile > row_align and footprint(row_tile, col_tile) > max_vmem_budget_bytes:
            row_tile = max(row_align, ((row_tile // 2) // row_align) * row_align)

    # If even a minimal-row full-width block busts the budget, tile the columns.
    if footprint(row_tile, col_tile) > max_vmem_budget_bytes and cols % _LANE == 0:
        col_tile = _LANE
        while (col_tile * 2 <= cols and
               footprint(row_tile, col_tile * 2) <= max_vmem_budget_bytes):
            col_tile *= 2
    # TODO(synk): if cols is a gigantic non-multiple of 128 the minimal block may
    # still exceed the budget; we then rely on vmem_limit_bytes below to absorb it.

    n_row = pl.cdiv(rows, row_tile)
    n_col = pl.cdiv(cols, col_tile)

    # v7x has 2 TensorCores: make sure there are >=2 schedulable blocks if possible.
    if n_row * n_col == 1:
        if rows > row_align:
            row_tile = _round_up(pl.cdiv(rows, 2), row_align)
        elif cols % _LANE == 0 and cols >= 2 * _LANE:
            col_tile = _round_up(pl.cdiv(cols, 2), _LANE)
        n_row = pl.cdiv(rows, row_tile)
        n_col = pl.cdiv(cols, col_tile)

    fp = footprint(row_tile, col_tile)
    vmem_limit = int(min(48 * 1024 * 1024, max(16 * 1024 * 1024, int(fp * 1.5))))

    # ---- specs: rows innermost so the shared weight block index never changes ------
    x_spec = pl.BlockSpec((row_tile, col_tile), lambda j, i: (i, j))
    o_spec = pl.BlockSpec((row_tile, col_tile), lambda j, i: (i, j))
    if mode == "column":
        w_spec = pl.BlockSpec((row_tile, 1), lambda j, i: (i, 0))
    elif mode == "shared":
        w_spec = pl.BlockSpec((1, col_tile), lambda j, i: (0, j))
    else:
        w_spec = pl.BlockSpec((row_tile, col_tile), lambda j, i: (i, j))

    out2d = pl.pallas_call(
        _scale_kernel,
        out_shape=jax.ShapeDtypeStruct((rows, cols), out_dtype),
        grid_spec=pltpu.PrefetchScalarGridSpec(
            num_scalar_prefetch=0,
            grid=(n_col, n_row),                # partial tails handled by OOB masking
            in_specs=[w_spec, x_spec],
            out_specs=o_spec,
        ),
        compiler_params=pltpu.CompilerParams(
            dimension_semantics=("parallel", "parallel"),
            vmem_limit_bytes=vmem_limit,
        ),
    )(w2d, x2d)

    return out2d.reshape(N, C, H, W)


if __name__ == "__main__":
    key = jax.random.PRNGKey(0)
    k1, k2, k3 = jax.random.split(key, 3)

    # --- primary: per-channel scale on a small NCHW activation (lane-dense hw) -----
    N, C, H, W = 2, 4, 16, 16
    dims = (1, C, 1, 1)
    init_scale = 1.0
    weight = jnp.ones(dims, dtype=jnp.float32) * init_scale
    weight = weight * (1.0 + 0.5 * jnp.arange(C, dtype=jnp.float32).reshape(1, C, 1, 1))
    x = jax.random.normal(k1, (N, C, H, W), dtype=jnp.float32)

    out = jax.block_until_ready(scale_module_forward(weight, x))
    ref = weight * x
    assert out.shape == x.shape and out.dtype == ref.dtype
    assert jnp.allclose(out, ref, atol=1e-6), "mismatch vs reference (per-channel)"

    # --- multi-block grid with a partial tail (rows not multiple of the tile) ------
    N2, C2 = 4, 50   # rows = 200; small byte target forces row_tile=64 -> tail block
    w2 = 0.25 + jax.random.uniform(k2, (1, C2, 1, 1), dtype=jnp.float32)
    x2 = jax.random.normal(k2, (N2, C2, H, W), dtype=jnp.float32)
    out2 = jax.block_until_ready(
        scale_module_forward(w2, x2, target_block_bytes=64 * 1024))
    assert jnp.allclose(out2, w2 * x2, atol=1e-6), "mismatch vs reference (tail)"

    # --- mixed dtype: bf16 activation, f32 weight -> f32 output (torch promotion) --
    xb = jax.random.normal(k3, (N, C, H, W), dtype=jnp.bfloat16)
    outb = jax.block_until_ready(scale_module_forward(weight, xb))
    refb = weight * xb
    assert outb.dtype == refb.dtype
    assert jnp.allclose(outb, refb, atol=1e-6), "mismatch vs reference (bf16 in)"

    # --- out_dtype override: compute in f32, write back bf16 -----------------------
    outb16 = jax.block_until_ready(
        scale_module_forward(weight, xb, out_dtype=jnp.bfloat16))
    assert outb16.dtype == jnp.bfloat16
    assert jnp.allclose(outb16.astype(jnp.float32),
                        refb.astype(jnp.bfloat16).astype(jnp.float32),
                        atol=1e-2, rtol=1e-2), "mismatch vs reference (bf16 out)"

    # --- spatially varying weight (compact, VMEM-resident shared row) --------------
    ws = jax.random.normal(k1, (1, 1, H, W), dtype=jnp.float32)
    outs = jax.block_until_ready(scale_module_forward(ws, x))
    assert jnp.allclose(outs, ws * x, atol=1e-6), "mismatch vs reference (spatial)"

    # --- non-lane-dense spatial dim (7x7): shared wide-row layout -------------------
    x7 = jax.random.normal(k2, (2, 4, 7, 7), dtype=jnp.float32)
    w7 = 0.5 + jax.random.uniform(k3, (1, 4, 1, 1), dtype=jnp.float32)
    out7 = jax.block_until_ready(scale_module_forward(w7, x7))
    assert jnp.allclose(out7, w7 * x7, atol=1e-6), "mismatch vs reference (7x7)"

    # --- weight varying along batch AND space (general streamed path) ---------------
    wf = jax.random.normal(k3, (N, 1, H, W), dtype=jnp.float32)
    outf = jax.block_until_ready(scale_module_forward(wf, x))
    assert jnp.allclose(outf, wf * x, atol=1e-6), "mismatch vs reference (full)"

    print("KERNEL_OK")
</pallas_src>

<mosaic_0001>
module attributes {stable_mosaic.version = 11 : i64} {
  func.func @_scale_kernel(%arg0: i32, %arg1: i32, %arg2: memref<8x1xf32, #tpu.memory_space<vmem>>, %arg3: memref<8x128xf32, #tpu.memory_space<vmem>>, %arg4: memref<8x128xf32, #tpu.memory_space<vmem>>) attributes {dimension_semantics = [#tpu.dimension_semantics<parallel>, #tpu.dimension_semantics<parallel>], iteration_bounds = array<i64: 2, 1>, scalar_prefetch = 0 : i64, scratch_operands = 0 : i64, tpu.core_type = #tpu.core_type<tc>, window_params = [{transform_indices = @transform_0, window_bounds = array<i64: 8, 1>}, {transform_indices = @transform_1, window_bounds = array<i64: 8, 128>}, {transform_indices = @transform_2, window_bounds = array<i64: 8, 128>}]} {
    %c0 = arith.constant 0 : index
    %c0_0 = arith.constant 0 : index
    %0 = vector.load %arg2[%c0, %c0_0] : memref<8x1xf32, #tpu.memory_space<vmem>>, vector<8x1xf32>
    %c0_1 = arith.constant 0 : index
    %c0_2 = arith.constant 0 : index
    %1 = vector.load %arg3[%c0_1, %c0_2] : memref<8x128xf32, #tpu.memory_space<vmem>>, vector<8x128xf32>
    %2 = vector.broadcast %0 : vector<8x1xf32> to vector<8x128xf32>
    %3 = arith.mulf %2, %1 : vector<8x128xf32>
    %c0_3 = arith.constant 0 : index
    %c0_4 = arith.constant 0 : index
    %4 = vector.load %arg4[%c0_3, %c0_4] : memref<8x128xf32, #tpu.memory_space<vmem>>, vector<8x128xf32>
    tpu.vector_store %arg4[%c0_3, %c0_4], %3 {strides = array<i32>} : memref<8x128xf32, #tpu.memory_space<vmem>>, vector<8x128xf32>,
    return
  }
  func.func @transform_0(%arg0: i32, %arg1: i32) -> (i32, i32) {
    %c0_i32 = arith.constant 0 : i32
    %c0_i32_0 = arith.constant 0 : i32
    return %arg1, %c0_i32 : i32, i32
  }
  func.func @transform_1(%arg0: i32, %arg1: i32) -> (i32, i32) {
    %c0_i32 = arith.constant 0 : i32
    return %arg1, %arg0 : i32, i32
  }
  func.func @transform_2(%arg0: i32, %arg1: i32) -> (i32, i32) {
    %c0_i32 = arith.constant 0 : i32
    return %arg1, %arg0 : i32, i32
  }
}

</mosaic_0001>

<bundles_post_ra>
// kernel: tpu_custom_call.1
= control target key start
LH: loop header
LB: loop body
LE: loop exit
PB: predicated region body
PF: predicated region fallthrough
CT: control target
= control target key end

     0   :  { %7 = vsyncpa [#allocation3], 0  ;;  %s651_s0 = inlined_call_operand.vmem [shape: f32[8,1], index: 0, kind: input, shape index: {}]   ;;  %s652_s1 = inlined_call_operand.hbm [shape: f32[8,256], index: 1, kind: input, shape index: {}]   ;;  %s653_s2 = inlined_call_operand.hbm [shape: f32[8,256], index: 2, kind: output, shape index: {}]  }
   0x1   :  { %9 = vsyncpa [#allocation3 + $0x1], 0 }
   0x2   :  { %10 = vsyncpa [#allocation4], 0 }
   0x3   :  { %12 = vsyncpa [#allocation4 + $0x1], 0  ;;  %s528_s9 = smov 0   ;;  %s530_s10 = smov 0  }
   0x4   :  { %s532_s11 = smov 0   ;;  %s534_s12 = smov 0  }
   0x5   :  { %s536_s13 = smov 0   ;;  %s538_s14 = smov 0  }
   0x6 LB: > { %s320_s15 = sadd.s32 4294967295, %s510_s14   ;;  %s321_s16 = sadd.s32 4294967294, %s510_s14   ;;  %s510_s14 = sphi %s538_s14, %s18_s14   ;;  %s506_s13 = sphi %s536_s13, %s662_s13   ;;  %s502_s12 = sphi %s534_s12, %s661_s12   ;;  %s498_s11 = sphi %s532_s11, %s660_s11   ;;  %s494_s10 = sphi %s530_s10, %s659_s10   ;;  %s490_s9 = sphi %s528_s9, %s658_s9  }
   0x7   : > { %s30_s17 = sadd.s32 1, %s506_s13  ;;  %s65_s18 = sadd.s32 1, %s498_s11 }
   0x8   : > { %p32_p0 = scmp.ge.s32.totalorder %s30_s17, 2  ;;  %p72_p1 = scmp.ne.s32.totalorder %s498_s11, %s494_s10 }
   0x9   : > { %p73_p2 = scmp.eq.s32.totalorder %s510_s14, 0  ;;  %p78_p3 = scmp.ne.s32.totalorder %s494_s10, %s490_s9 }
   0xa   : > { %s664_s17 = smov (%p32_p0, %s30_s17), 0  ;;  %p79_p5 = scmp.eq.s32.totalorder %s320_s15, 0 }
   0xb   : > { %p569_p4 = por %p73_p2, %p72_p1  ;;  %s61_s20 = ssub.s32 %s506_s13, %s664_s17 }
   0xc   : > { %p104_p6 = scmp.eq.s32.totalorder %s320_s15, 1  ;;  %p63_p7 = scmp.eq.s32.totalorder %s61_s20, 0 }
   0xd   : > { %p575_p8 = por %p79_p5, %p78_p3  ;;  %p110_p10 = scmp.eq.s32.totalorder %s321_s16, 1 }
   0xe   : > { %p579_p9 = por %p104_p6, %p72_p1  ;;  %p324_p12 = scmp.ge.s32.totalorder %s510_s14, 2 }
   0xf   : > { %s584_s23 = scalar_select %p63_p7, %s498_s11, %s65_s18  }
  0x10   : > { %p586_p11 = por %p110_p10, %p78_p3  ;;  %p346_p13 = scmp.lt.s32.totalorder %s510_s14, 2 }
  0x11   : > { %s137_s25 = sand.u32 1, %s498_s11   ;;  %s326_s27 = sshll.u32 %s506_s13, 3 }
  0x12   : > { %s325_s26 = sshll.u32 %s137_s25, 3  ;;  %s147_s30 = scalar_lea.hbm %s652_s1, %s326_s27 }
  0x13   : > { %s141_s3 = scalar_lea.vmem [#allocation2], %s325_s26  ;;  %s149_s5 = sshll.u32 %s147_s30, 4  ;;  %s150_s5 = int_to_ptr.hbm [resolvable:$true] %s149_s5 }
  0x14   : > { %s151_s4 = sshll.u32 %s141_s3, 4  ;;  %p339_p0 = pnand %p346_p13, %p569_p4  ;;  %s152_s4 = int_to_ptr.vmem [resolvable:$true] %s151_s4 }
  0x15   : > { %p327_p1 = scmp.ge.s32.totalorder %s510_s14, 1  ;;  %p156_p2 = scmp.lt.s32.totalorder %s510_s14, 3 }
  0x16   : > { %s138_s6 = scalar_lea.sflag [#allocation3], %s137_s25 }
  0x17   : > { %341 = dma.hbm_to_vmem [thread:$0]  (!%p339_p0), %s150_s5, 128, %s152_s4, %s138_s6  }
  0x18   : > { %p157_p3 = pnand %p327_p1, %p156_p2 }
  0x19   : > { %s602_s7 = sand.u32 (!%p157_p3), 1, %s494_s10  }
  0x1a   : > { %160 = sbr.rel (%p157_p3) target bundleno = 154 (0x9a), region = 28  ;;  %s328_s8 = sshll.u32 (!%p157_p3), %s602_s7, 3 }
  0x1b   : > { %s163_s15 = scalar_lea.sflag (!%p157_p3), [#allocation3], %s602_s7  ;;  %s166_s16 = scalar_lea.vmem (!%p157_p3), [#allocation2], %s328_s8 }
  0x1f   : > { %481 = dma.done.wait (%p575_p8), %s163_s15, 128  }
  0x20   : > { %483 = vsyncadd (%p575_p8), %s163_s15, 4294967168  ;;  %v512_v0 = vmov 0   ;;  %v196_v1 = vld [vmem:[%s651_s0] sm:$0xff]  ;;  %s331_s20 = sshll.u32 %s502_s12, 3  ;;  %s191_s28 = scalar_lea.vmem [#allocation5], %s328_s8 }
  0x21   : > { %397 = vset.pattern.permute.xlu0 %v512_v0  ;;  %s218_s27 = scalar_lea.hbm %s653_s2, %s331_s20  ;;  %v197_v2 = vld [vmem:[%s166_s16] sm:$0xff]  ;;  %s220_s29 = sshll.u32 %s191_s28, 4  ;;  %s221_s29 = int_to_ptr.vmem [resolvable:$true] %s220_s29 }
  0x22   : > { %200 = vperm.xlu0 %397, %v196_v1   ;;  %s222_s21 = sshll.u32 %s218_s27, 4  ;;  %s206_s30 = scalar_lea.sflag [#allocation4], %s602_s7  ;;  %s223_s21 = int_to_ptr.hbm [resolvable:$true] %s222_s21 }
  0x23   : > { %s442_s3 = sshra.s32 %s223_s21, 4  ;;  %s448_s6 = scalar_lea.hbm %s653_s2, 16  ;;  %s443_s3 = int_to_ptr.hbm [resolvable:$true] %s442_s3 }
  0x24   : > { %s444_s4 = scalar_lea.hbm %s443_s3, 8  ;;  %p449_p7 = scmp.lt.s32.totalorder %s443_s3, %s653_s2 }
  0x25   : > { %p445_p4 = scmp.ne.s32.totalorder %s443_s3, %s444_s4  ;;  %p450_p8 = scmp.lt.s32.totalorder %s448_s6, %s444_s4 }
  0x27   : > { %p446_p5 = pnand %p445_p4, %p579_p9  ;;  %p451_p10 = por %p450_p8, %p449_p7 }
  0x29   : > { %p447_p6 = pneg %p446_p5 }
  0x2b   : > { %p452_p13 = pnand %p451_p10, %p447_p6 }
  0x94   : > { %v201_v3 = vpop.permute.xlu0 %200 }
  0x95   : > { %v203_v4 = vmul.f32 %v201_v3, %v197_v2 }
  0x97   : > { %204 = vst [vmem:[%s191_s28] sm:$0xff] %v203_v4 }
  0x98   : > { %455 = shalt.err (!%p452_p13)
}
  0x99   : > { %336 = dma.vmem_to_hbm [thread:$0]  (%p579_p9), %s221_s29, 128, %s223_s21, %s206_s30  }
  0x9a PF: > { %s234_s7 = sand.u32 1, %s490_s9   ;;  %p343_p0 = pnand %p324_p12, %p586_p11 }
  0x9b   : > { %s235_s16 = scalar_lea.sflag [#allocation4], %s234_s7 }
  0x9c   : > { %p344_p1 = pneg %p343_p0 }
  0x9e   : > { %485 = dma.done.wait (%p344_p1), %s235_s16, 128  }
  0x9f   : > { %487 = vsyncadd (%p344_p1), %s235_s16, 4294967168  ;;  %s18_s14 = sadd.s32 1, %s510_s14   ;;  %s658_s9 = smov %s494_s10 }
  0xa0   : > { %p15_p2 = scmp.ge.s32.totalorder %s18_s14, 4   ;;  %s659_s10 = smov %s498_s11 }
  0xa1   : > { %s660_s11 = smov %s584_s23  ;;  %s661_s12 = smov %s506_s13 }
  0xa2   : > { %s662_s13 = smov %s664_s17  ;;  %17 = sbr.rel (!%p15_p2) target bundleno = 6 (0x6), region = 76 }
  0xa7   :  { %241 = vsyncpa [#allocation3], 1 }
  0xa8   :  { %243 = vsyncpa [#allocation3 + $0x1], 1 }
  0xa9   :  { %244 = vsyncpa [#allocation4], 1 }
  0xaa   :  { %246 = vsyncpa [#allocation4 + $0x1], 1 }

</bundles_post_ra>
